<compile_context>
chip_gen: v7x
topology: tpu7x:2x2x1
jax: 0.10.0
libtpu: 0.0.40
codegen_flags: <defaults>
</compile_context>

<pallas_src>
import functools
import math

import jax
import jax.numpy as jnp
import numpy as np
from jax.experimental import pallas as pl
from jax.experimental.pallas import tpu as pltpu

LN_EPS = 1e-5  # torch.nn.LayerNorm default eps

# Lane layout inside the packed (16, 128) parameter slab.
_A_COL = 0       # P[:, 0]      fc1 weight column acting on the continuous var (16,)
_C0_COL = 1      # P[:, 1]      fused emb[0] @ W1[1:5] + b1                    (16,)
_C1_COL = 2      # P[:, 2]      fused emb[1] @ W1[1:5] + b1                    (16,)
_B2_COL = 3      # P[0:8, 3]    fc2 bias / temperature, duplicated x2           (8,)
_G_COL = 4       # P[0:8, 4]    LayerNorm gamma, duplicated x2                  (8,)
_BETA_COL = 5    # P[0:8, 5]    LayerNorm beta, duplicated x2                   (8,)
_W2_COL0 = 8     # P[0:8, 8:24] fc2 weight (out=4, in=16)/temperature, dup x2


def ehr_kernel(x_ref, p_ref, out_ref):
    bblk = x_ref.shape[1]

    cat = x_ref[0:1, :]                      # (1, bblk)  categorical var (0/1) as f32
    cont = x_ref[1:2, :]                     # (1, bblk)  continuous var

    a = p_ref[:, _A_COL:_A_COL + 1]          # (16, 1)
    c0 = p_ref[:, _C0_COL:_C0_COL + 1]       # (16, 1)
    c1 = p_ref[:, _C1_COL:_C1_COL + 1]       # (16, 1)

    # Embedding lookup + fc1 fused: VPU select of the per-category constant plus
    # a rank-1 broadcast FMA (no MXU, no one-hot matmul). `< 0.5` is robust to
    # the categorical value arriving as a slightly-off float.
    c_sel = jnp.where(cat < 0.5, c0, c1)             # (16, bblk)
    h = jnp.maximum(a * cont + c_sel, 0.0)           # (16, bblk)  ReLU(fc1(...))

    # fc2 (16 -> 4) as 16 unrolled VPU broadcast-FMAs on a DUPLICATED 8-row
    # slab (rows 0-3 == rows 4-7).  Same vreg count as a 4-row tile, but lets
    # the output be produced without a sublane concatenate.  1/temperature is
    # already folded into w2 / b2 at pack time.
    w2t = p_ref[0:8, _W2_COL0:_W2_COL0 + 16]         # (8, 16)
    logits = jnp.broadcast_to(p_ref[0:8, _B2_COL:_B2_COL + 1], (8, bblk))
    for k in range(16):
        logits = logits + w2t[:, k:k + 1] * h[k:k + 1, :]

    # LayerNorm over the feature rows (sublane dim).  Because both 4-row halves
    # are identical, the mean/biased-variance over 8 rows equals the torch
    # LayerNorm statistics over the 4 features.
    mean = jnp.mean(logits, axis=0, keepdims=True)
    var = jnp.mean((logits - mean) ** 2, axis=0, keepdims=True)
    normed = (logits - mean) * jax.lax.rsqrt(var + LN_EPS)
    normed = (normed * p_ref[0:8, _G_COL:_G_COL + 1]
              + p_ref[0:8, _BETA_COL:_BETA_COL + 1])

    # One lane-dense (8, bblk) store: rows 0-3 = logits (post-LN, matching the
    # PyTorch reassignment), rows 4-7 = sigmoid(logits).  Sigmoid runs on the
    # EUP (separate issue slot); the row mask is a cheap VPU select.
    row = jax.lax.broadcasted_iota(jnp.int32, (8, bblk), 0)
    out_ref[...] = jnp.where(row >= 4, jax.nn.sigmoid(normed), normed)


def init_params(key, ehr_output_size=4, temperature=1.0):
    """Matches the PyTorch module's initialization (weights stored as (in, out))."""
    k_emb, k_w1, k_w2 = jax.random.split(key, 3)
    emb = jax.random.normal(k_emb, (2, 4), dtype=jnp.float32)          # nn.Embedding(2,4)
    bound1 = math.sqrt(6.0 / (5 + 16))                                  # xavier_uniform
    w1 = jax.random.uniform(k_w1, (5, 16), minval=-bound1, maxval=bound1,
                            dtype=jnp.float32)
    b1 = jnp.zeros((16,), jnp.float32)
    bound2 = math.sqrt(6.0 / (16 + ehr_output_size))
    w2 = jax.random.uniform(k_w2, (16, ehr_output_size), minval=-bound2,
                            maxval=bound2, dtype=jnp.float32)
    b2 = jnp.zeros((ehr_output_size,), jnp.float32)
    gamma = jnp.ones((ehr_output_size,), jnp.float32)
    beta = jnp.zeros((ehr_output_size,), jnp.float32)
    return dict(emb=emb, w1=w1, b1=b1, w2=w2, b2=b2, gamma=gamma, beta=beta,
                temperature=temperature)


def pack_params(params):
    """Fuse embedding+fc1 constants and temperature, pack into one (16,128) slab."""
    hi = jax.lax.Precision.HIGHEST
    emb, w1, b1 = params["emb"], params["w1"], params["b1"]
    w2, b2 = params["w2"], params["b2"]
    gamma, beta = params["gamma"], params["beta"]
    inv_t = jnp.float32(1.0 / params["temperature"])

    a = w1[0, :]                                               # (16,)
    c = jnp.dot(emb, w1[1:5, :], precision=hi) + b1            # (2, 16)
    w2t = w2.T * inv_t                                         # (4, 16)
    b2t = b2 * inv_t                                           # (4,)

    p = jnp.zeros((16, 128), jnp.float32)
    p = p.at[:, _A_COL].set(a)
    p = p.at[:, _C0_COL].set(c[0])
    p = p.at[:, _C1_COL].set(c[1])
    p = p.at[0:8, _B2_COL].set(jnp.tile(b2t, 2))
    p = p.at[0:8, _G_COL].set(jnp.tile(gamma, 2))
    p = p.at[0:8, _BETA_COL].set(jnp.tile(beta, 2))
    p = p.at[0:8, _W2_COL0:_W2_COL0 + 16].set(jnp.tile(w2t, (2, 1)))
    return p


def _round_up(n, m):
    return ((n + m - 1) // m) * m


@functools.partial(jax.jit, static_argnames=("block_b",))
def ehr_classifier(x, packed_params, block_b=1024):
    B = x.shape[0]
    x2 = x.reshape(B, -1)[:, :2].astype(jnp.float32)   # x.view(B, -1), cols 0/1
    xt = x2.T                                          # (2, B): row0 cat, row1 cont

    bblk = min(block_b, _round_up(B, 128))             # lane-dense batch block
    bp = _round_up(B, bblk)
    if bp != B:
        xt = jnp.pad(xt, ((0, 0), (0, bp - B)))
    nblk = bp // bblk

    out = pl.pallas_call(
        ehr_kernel,
        out_shape=jax.ShapeDtypeStruct((8, bp), jnp.float32),
        grid_spec=pltpu.PrefetchScalarGridSpec(
            num_scalar_prefetch=0,
            grid=(nblk,),
            in_specs=[
                pl.BlockSpec((2, bblk), lambda i: (0, i)),    # batch-tiled input
                pl.BlockSpec((16, 128), lambda i: (0, 0)),    # constant param slab
            ],
            out_specs=pl.BlockSpec((8, bblk), lambda i: (0, i)),
        ),
        compiler_params=pltpu.CompilerParams(
            dimension_semantics=("parallel",)),
    )(xt, packed_params)

    logits = out[0:4, :B].T                             # (B, 4)
    probs = out[4:8, :B].T                              # (B, 4)
    return logits, probs


def ehr_reference(x, params):
    """Pure-JAX translation of the PyTorch forward, for verification."""
    hi = jax.lax.Precision.HIGHEST
    B = x.shape[0]
    xf = x.reshape(B, -1).astype(jnp.float32)
    cont = xf[:, 1:2]
    cat = xf[:, 0].astype(jnp.int32)
    embedded = params["emb"][cat]                                     # (B, 4)
    inp = jnp.concatenate([cont, embedded], axis=1)                   # (B, 5)
    h = jax.nn.relu(jnp.dot(inp, params["w1"], precision=hi) + params["b1"])
    logits = (jnp.dot(h, params["w2"], precision=hi) + params["b2"]) / params["temperature"]
    mean = jnp.mean(logits, axis=-1, keepdims=True)
    var = jnp.mean((logits - mean) ** 2, axis=-1, keepdims=True)
    normed = (logits - mean) * jax.lax.rsqrt(var + LN_EPS)
    normed = normed * params["gamma"] + params["beta"]
    return normed, jax.nn.sigmoid(normed)


def _check(B, key, params, packed):
    k_cat, k_cont = jax.random.split(key)
    categorical = jax.random.randint(k_cat, (B, 1), 0, 2).astype(jnp.float32)
    continuous = jax.random.normal(k_cont, (B, 1), dtype=jnp.float32)
    x = jnp.concatenate([categorical, continuous], axis=1)   # (B, 2)

    logits, probs = ehr_classifier(x, packed)
    jax.block_until_ready((logits, probs))

    assert logits.shape == (B, 4) and probs.shape == (B, 4)
    ref_logits, ref_probs = ehr_reference(x, params)
    np.testing.assert_allclose(np.asarray(logits), np.asarray(ref_logits),
                               atol=2e-5, rtol=1e-4)
    np.testing.assert_allclose(np.asarray(probs), np.asarray(ref_probs),
                               atol=2e-5, rtol=1e-4)


if __name__ == "__main__":
    key = jax.random.PRNGKey(0)
    k_param, k_small, k_pad = jax.random.split(key, 3)

    params = init_params(k_param)
    packed = pack_params(params)

    _check(8, k_small, params, packed)     # small batch (single padded block)
    _check(200, k_pad, params, packed)     # non-multiple-of-128 batch (padding path)

    print("KERNEL_OK")
</pallas_src>

<mosaic_0001>
module attributes {stable_mosaic.version = 11 : i64} {
  func.func @ehr_kernel(%arg0: i32, %arg1: memref<2x128xf32, #tpu.memory_space<vmem>>, %arg2: memref<16x128xf32, #tpu.memory_space<vmem>>, %arg3: memref<8x128xf32, #tpu.memory_space<vmem>>) attributes {dimension_semantics = [#tpu.dimension_semantics<parallel>], iteration_bounds = array<i64: 1>, scalar_prefetch = 0 : i64, scratch_operands = 0 : i64, tpu.core_type = #tpu.core_type<tc>, window_params = [{transform_indices = @transform_0, window_bounds = array<i64: 2, 128>}, {pipeline_mode = #tpu.pipeline_mode<synchronous>, transform_indices = @transform_1, window_bounds = array<i64: 16, 128>}, {transform_indices = @transform_2, window_bounds = array<i64: 8, 128>}]} {
    %c0 = arith.constant 0 : index
    %c0_0 = arith.constant 0 : index
    %0 = vector.load %arg1[%c0, %c0_0] : memref<2x128xf32, #tpu.memory_space<vmem>>, vector<1x128xf32>
    %c1 = arith.constant 1 : index
    %c0_1 = arith.constant 0 : index
    %1 = vector.load %arg1[%c1, %c0_1] : memref<2x128xf32, #tpu.memory_space<vmem>>, vector<1x128xf32>
    %c0_2 = arith.constant 0 : index
    %c0_3 = arith.constant 0 : index
    %2 = vector.load %arg2[%c0_2, %c0_3] : memref<16x128xf32, #tpu.memory_space<vmem>>, vector<16x1xf32>
    %c0_4 = arith.constant 0 : index
    %c1_5 = arith.constant 1 : index
    %3 = vector.load %arg2[%c0_4, %c1_5] : memref<16x128xf32, #tpu.memory_space<vmem>>, vector<16x1xf32>
    %c0_6 = arith.constant 0 : index
    %c2 = arith.constant 2 : index
    %4 = vector.load %arg2[%c0_6, %c2] : memref<16x128xf32, #tpu.memory_space<vmem>>, vector<16x1xf32>
    %cst = arith.constant 5.000000e-01 : f32
    %5 = vector.broadcast %cst : f32 to vector<1x128xf32>
    %6 = arith.cmpf olt, %0, %5 : vector<1x128xf32>
    %7 = vector.shape_cast %6 : vector<1x128xi1> to vector<1x128xi1>
    %8 = vector.broadcast %7 : vector<1x128xi1> to vector<16x128xi1>
    %9 = vector.shape_cast %3 : vector<16x1xf32> to vector<16x1xf32>
    %10 = vector.broadcast %9 : vector<16x1xf32> to vector<16x128xf32>
    %11 = vector.shape_cast %4 : vector<16x1xf32> to vector<16x1xf32>
    %12 = vector.broadcast %11 : vector<16x1xf32> to vector<16x128xf32>
    %13 = arith.select %8, %10, %12 : vector<16x128xi1>, vector<16x128xf32>
    %14 = vector.broadcast %2 : vector<16x1xf32> to vector<16x128xf32>
    %15 = vector.broadcast %1 : vector<1x128xf32> to vector<16x128xf32>
    %16 = arith.mulf %14, %15 : vector<16x128xf32>
    %17 = arith.addf %16, %13 : vector<16x128xf32>
    %cst_7 = arith.constant 0.000000e+00 : f32
    %18 = vector.broadcast %cst_7 : f32 to vector<16x128xf32>
    %19 = arith.maximumf %17, %18 : vector<16x128xf32>
    %c0_8 = arith.constant 0 : index
    %c8 = arith.constant 8 : index
    %20 = vector.load %arg2[%c0_8, %c8] : memref<16x128xf32, #tpu.memory_space<vmem>>, vector<8x16xf32>
    %c0_9 = arith.constant 0 : index
    %c3 = arith.constant 3 : index
    %21 = vector.load %arg2[%c0_9, %c3] : memref<16x128xf32, #tpu.memory_space<vmem>>, vector<8x1xf32>
    %22 = vector.shape_cast %21 : vector<8x1xf32> to vector<8x1xf32>
    %23 = vector.broadcast %22 : vector<8x1xf32> to vector<8x128xf32>
    %24 = vector.extract_strided_slice %20 {offsets = [0, 0], sizes = [8, 1], strides = [1, 1]} : vector<8x16xf32> to vector<8x1xf32>
    %25 = vector.extract_strided_slice %19 {offsets = [0, 0], sizes = [1, 128], strides = [1, 1]} : vector<16x128xf32> to vector<1x128xf32>
    %26 = vector.broadcast %24 : vector<8x1xf32> to vector<8x128xf32>
    %27 = vector.broadcast %25 : vector<1x128xf32> to vector<8x128xf32>
    %28 = arith.mulf %26, %27 : vector<8x128xf32>
    %29 = arith.addf %23, %28 : vector<8x128xf32>
    %30 = vector.extract_strided_slice %20 {offsets = [0, 1], sizes = [8, 1], strides = [1, 1]} : vector<8x16xf32> to vector<8x1xf32>
    %31 = vector.extract_strided_slice %19 {offsets = [1, 0], sizes = [1, 128], strides = [1, 1]} : vector<16x128xf32> to vector<1x128xf32>
    %32 = vector.broadcast %30 : vector<8x1xf32> to vector<8x128xf32>
    %33 = vector.broadcast %31 : vector<1x128xf32> to vector<8x128xf32>
    %34 = arith.mulf %32, %33 : vector<8x128xf32>
    %35 = arith.addf %29, %34 : vector<8x128xf32>
    %36 = vector.extract_strided_slice %20 {offsets = [0, 2], sizes = [8, 1], strides = [1, 1]} : vector<8x16xf32> to vector<8x1xf32>
    %37 = vector.extract_strided_slice %19 {offsets = [2, 0], sizes = [1, 128], strides = [1, 1]} : vector<16x128xf32> to vector<1x128xf32>
    %38 = vector.broadcast %36 : vector<8x1xf32> to vector<8x128xf32>
    %39 = vector.broadcast %37 : vector<1x128xf32> to vector<8x128xf32>
    %40 = arith.mulf %38, %39 : vector<8x128xf32>
    %41 = arith.addf %35, %40 : vector<8x128xf32>
    %42 = vector.extract_strided_slice %20 {offsets = [0, 3], sizes = [8, 1], strides = [1, 1]} : vector<8x16xf32> to vector<8x1xf32>
    %43 = vector.extract_strided_slice %19 {offsets = [3, 0], sizes = [1, 128], strides = [1, 1]} : vector<16x128xf32> to vector<1x128xf32>
    %44 = vector.broadcast %42 : vector<8x1xf32> to vector<8x128xf32>
    %45 = vector.broadcast %43 : vector<1x128xf32> to vector<8x128xf32>
    %46 = arith.mulf %44, %45 : vector<8x128xf32>
    %47 = arith.addf %41, %46 : vector<8x128xf32>
    %48 = vector.extract_strided_slice %20 {offsets = [0, 4], sizes = [8, 1], strides = [1, 1]} : vector<8x16xf32> to vector<8x1xf32>
    %49 = vector.extract_strided_slice %19 {offsets = [4, 0], sizes = [1, 128], strides = [1, 1]} : vector<16x128xf32> to vector<1x128xf32>
    %50 = vector.broadcast %48 : vector<8x1xf32> to vector<8x128xf32>
    %51 = vector.broadcast %49 : vector<1x128xf32> to vector<8x128xf32>
    %52 = arith.mulf %50, %51 : vector<8x128xf32>
    %53 = arith.addf %47, %52 : vector<8x128xf32>
    %54 = vector.extract_strided_slice %20 {offsets = [0, 5], sizes = [8, 1], strides = [1, 1]} : vector<8x16xf32> to vector<8x1xf32>
    %55 = vector.extract_strided_slice %19 {offsets = [5, 0], sizes = [1, 128], strides = [1, 1]} : vector<16x128xf32> to vector<1x128xf32>
    %56 = vector.broadcast %54 : vector<8x1xf32> to vector<8x128xf32>
    %57 = vector.broadcast %55 : vector<1x128xf32> to vector<8x128xf32>
    %58 = arith.mulf %56, %57 : vector<8x128xf32>
    %59 = arith.addf %53, %58 : vector<8x128xf32>
    %60 = vector.extract_strided_slice %20 {offsets = [0, 6], sizes = [8, 1], strides = [1, 1]} : vector<8x16xf32> to vector<8x1xf32>
    %61 = vector.extract_strided_slice %19 {offsets = [6, 0], sizes = [1, 128], strides = [1, 1]} : vector<16x128xf32> to vector<1x128xf32>
    %62 = vector.broadcast %60 : vector<8x1xf32> to vector<8x128xf32>
    %63 = vector.broadcast %61 : vector<1x128xf32> to vector<8x128xf32>
    %64 = arith.mulf %62, %63 : vector<8x128xf32>
    %65 = arith.addf %59, %64 : vector<8x128xf32>
    %66 = vector.extract_strided_slice %20 {offsets = [0, 7], sizes = [8, 1], strides = [1, 1]} : vector<8x16xf32> to vector<8x1xf32>
    %67 = vector.extract_strided_slice %19 {offsets = [7, 0], sizes = [1, 128], strides = [1, 1]} : vector<16x128xf32> to vector<1x128xf32>
    %68 = vector.broadcast %66 : vector<8x1xf32> to vector<8x128xf32>
    %69 = vector.broadcast %67 : vector<1x128xf32> to vector<8x128xf32>
    %70 = arith.mulf %68, %69 : vector<8x128xf32>
    %71 = arith.addf %65, %70 : vector<8x128xf32>
    %72 = vector.extract_strided_slice %20 {offsets = [0, 8], sizes = [8, 1], strides = [1, 1]} : vector<8x16xf32> to vector<8x1xf32>
    %73 = vector.extract_strided_slice %19 {offsets = [8, 0], sizes = [1, 128], strides = [1, 1]} : vector<16x128xf32> to vector<1x128xf32>
    %74 = vector.broadcast %72 : vector<8x1xf32> to vector<8x128xf32>
    %75 = vector.broadcast %73 : vector<1x128xf32> to vector<8x128xf32>
    %76 = arith.mulf %74, %75 : vector<8x128xf32>
    %77 = arith.addf %71, %76 : vector<8x128xf32>
    %78 = vector.extract_strided_slice %20 {offsets = [0, 9], sizes = [8, 1], strides = [1, 1]} : vector<8x16xf32> to vector<8x1xf32>
    %79 = vector.extract_strided_slice %19 {offsets = [9, 0], sizes = [1, 128], strides = [1, 1]} : vector<16x128xf32> to vector<1x128xf32>
    %80 = vector.broadcast %78 : vector<8x1xf32> to vector<8x128xf32>
    %81 = vector.broadcast %79 : vector<1x128xf32> to vector<8x128xf32>
    %82 = arith.mulf %80, %81 : vector<8x128xf32>
    %83 = arith.addf %77, %82 : vector<8x128xf32>
    %84 = vector.extract_strided_slice %20 {offsets = [0, 10], sizes = [8, 1], strides = [1, 1]} : vector<8x16xf32> to vector<8x1xf32>
    %85 = vector.extract_strided_slice %19 {offsets = [10, 0], sizes = [1, 128], strides = [1, 1]} : vector<16x128xf32> to vector<1x128xf32>
    %86 = vector.broadcast %84 : vector<8x1xf32> to vector<8x128xf32>
    %87 = vector.broadcast %85 : vector<1x128xf32> to vector<8x128xf32>
    %88 = arith.mulf %86, %87 : vector<8x128xf32>
    %89 = arith.addf %83, %88 : vector<8x128xf32>
    %90 = vector.extract_strided_slice %20 {offsets = [0, 11], sizes = [8, 1], strides = [1, 1]} : vector<8x16xf32> to vector<8x1xf32>
    %91 = vector.extract_strided_slice %19 {offsets = [11, 0], sizes = [1, 128], strides = [1, 1]} : vector<16x128xf32> to vector<1x128xf32>
    %92 = vector.broadcast %90 : vector<8x1xf32> to vector<8x128xf32>
    %93 = vector.broadcast %91 : vector<1x128xf32> to vector<8x128xf32>
    %94 = arith.mulf %92, %93 : vector<8x128xf32>
    %95 = arith.addf %89, %94 : vector<8x128xf32>
    %96 = vector.extract_strided_slice %20 {offsets = [0, 12], sizes = [8, 1], strides = [1, 1]} : vector<8x16xf32> to vector<8x1xf32>
    %97 = vector.extract_strided_slice %19 {offsets = [12, 0], sizes = [1, 128], strides = [1, 1]} : vector<16x128xf32> to vector<1x128xf32>
    %98 = vector.broadcast %96 : vector<8x1xf32> to vector<8x128xf32>
    %99 = vector.broadcast %97 : vector<1x128xf32> to vector<8x128xf32>
    %100 = arith.mulf %98, %99 : vector<8x128xf32>
    %101 = arith.addf %95, %100 : vector<8x128xf32>
    %102 = vector.extract_strided_slice %20 {offsets = [0, 13], sizes = [8, 1], strides = [1, 1]} : vector<8x16xf32> to vector<8x1xf32>
    %103 = vector.extract_strided_slice %19 {offsets = [13, 0], sizes = [1, 128], strides = [1, 1]} : vector<16x128xf32> to vector<1x128xf32>
    %104 = vector.broadcast %102 : vector<8x1xf32> to vector<8x128xf32>
    %105 = vector.broadcast %103 : vector<1x128xf32> to vector<8x128xf32>
    %106 = arith.mulf %104, %105 : vector<8x128xf32>
    %107 = arith.addf %101, %106 : vector<8x128xf32>
    %108 = vector.extract_strided_slice %20 {offsets = [0, 14], sizes = [8, 1], strides = [1, 1]} : vector<8x16xf32> to vector<8x1xf32>
    %109 = vector.extract_strided_slice %19 {offsets = [14, 0], sizes = [1, 128], strides = [1, 1]} : vector<16x128xf32> to vector<1x128xf32>
    %110 = vector.broadcast %108 : vector<8x1xf32> to vector<8x128xf32>
    %111 = vector.broadcast %109 : vector<1x128xf32> to vector<8x128xf32>
    %112 = arith.mulf %110, %111 : vector<8x128xf32>
    %113 = arith.addf %107, %112 : vector<8x128xf32>
    %114 = vector.extract_strided_slice %20 {offsets = [0, 15], sizes = [8, 1], strides = [1, 1]} : vector<8x16xf32> to vector<8x1xf32>
    %115 = vector.extract_strided_slice %19 {offsets = [15, 0], sizes = [1, 128], strides = [1, 1]} : vector<16x128xf32> to vector<1x128xf32>
    %116 = vector.broadcast %114 : vector<8x1xf32> to vector<8x128xf32>
    %117 = vector.broadcast %115 : vector<1x128xf32> to vector<8x128xf32>
    %118 = arith.mulf %116, %117 : vector<8x128xf32>
    %119 = arith.addf %113, %118 : vector<8x128xf32>
    %cst_10 = arith.constant dense<0.000000e+00> : vector<128xf32>
    %120 = vector.multi_reduction <add>, %119, %cst_10 [0] : vector<8x128xf32> to vector<128xf32>
    %121 = vector.shape_cast %120 : vector<128xf32> to vector<1x128xf32>
    %cst_11 = arith.constant 8.000000e+00 : f32
    %122 = vector.broadcast %cst_11 : f32 to vector<1x128xf32>
    %123 = arith.divf %121, %122 : vector<1x128xf32>
    %124 = vector.broadcast %123 : vector<1x128xf32> to vector<8x128xf32>
    %125 = arith.subf %119, %124 : vector<8x128xf32>
    %126 = arith.mulf %125, %125 : vector<8x128xf32>
    %cst_12 = arith.constant dense<0.000000e+00> : vector<128xf32>
    %127 = vector.multi_reduction <add>, %126, %cst_12 [0] : vector<8x128xf32> to vector<128xf32>
    %128 = vector.shape_cast %127 : vector<128xf32> to vector<1x128xf32>
    %cst_13 = arith.constant 8.000000e+00 : f32
    %129 = vector.broadcast %cst_13 : f32 to vector<1x128xf32>
    %130 = arith.divf %128, %129 : vector<1x128xf32>
    %131 = vector.broadcast %123 : vector<1x128xf32> to vector<8x128xf32>
    %132 = arith.subf %119, %131 : vector<8x128xf32>
    %cst_14 = arith.constant 9.99999974E-6 : f32
    %133 = vector.broadcast %cst_14 : f32 to vector<1x128xf32>
    %134 = arith.addf %130, %133 : vector<1x128xf32>
    %135 = math.rsqrt %134 : vector<1x128xf32>
    %136 = vector.broadcast %135 : vector<1x128xf32> to vector<8x128xf32>
    %137 = arith.mulf %132, %136 : vector<8x128xf32>
    %c0_15 = arith.constant 0 : index
    %c4 = arith.constant 4 : index
    %138 = vector.load %arg2[%c0_15, %c4] : memref<16x128xf32, #tpu.memory_space<vmem>>, vector<8x1xf32>
    %139 = vector.broadcast %138 : vector<8x1xf32> to vector<8x128xf32>
    %140 = arith.mulf %137, %139 : vector<8x128xf32>
    %c0_16 = arith.constant 0 : index
    %c5 = arith.constant 5 : index
    %141 = vector.load %arg2[%c0_16, %c5] : memref<16x128xf32, #tpu.memory_space<vmem>>, vector<8x1xf32>
    %142 = vector.broadcast %141 : vector<8x1xf32> to vector<8x128xf32>
    %143 = arith.addf %140, %142 : vector<8x128xf32>
    %144 = tpu.iota {dimensions = array<i32: 0>} : vector<8x128xi32>
    %c4_i32 = arith.constant 4 : i32
    %145 = vector.broadcast %c4_i32 : i32 to vector<8x128xi32>
    %146 = arith.cmpi sge, %144, %145 : vector<8x128xi32>
    %147 = arith.negf %143 : vector<8x128xf32>
    %148 = math.exp %147 : vector<8x128xf32>
    %cst_17 = arith.constant 1.000000e+00 : f32
    %149 = vector.broadcast %cst_17 : f32 to vector<8x128xf32>
    %150 = arith.addf %149, %148 : vector<8x128xf32>
    %151 = arith.divf %149, %150 : vector<8x128xf32>
    %152 = arith.select %146, %151, %143 : vector<8x128xi1>, vector<8x128xf32>
    %c0_18 = arith.constant 0 : index
    %c0_19 = arith.constant 0 : index
    %153 = vector.load %arg3[%c0_18, %c0_19] : memref<8x128xf32, #tpu.memory_space<vmem>>, vector<8x128xf32>
    tpu.vector_store %arg3[%c0_18, %c0_19], %152 {strides = array<i32>} : memref<8x128xf32, #tpu.memory_space<vmem>>, vector<8x128xf32>,
    return
  }
  func.func @transform_0(%arg0: i32) -> (i32, i32) {
    %c0_i32 = arith.constant 0 : i32
    %c0_i32_0 = arith.constant 0 : i32
    return %c0_i32, %arg0 : i32, i32
  }
  func.func @transform_1(%arg0: i32) -> (i32, i32) {
    %c0_i32 = arith.constant 0 : i32
    %c0_i32_0 = arith.constant 0 : i32
    %c0_i32_1 = arith.constant 0 : i32
    return %c0_i32, %c0_i32_0 : i32, i32
  }
  func.func @transform_2(%arg0: i32) -> (i32, i32) {
    %c0_i32 = arith.constant 0 : i32
    %c0_i32_0 = arith.constant 0 : i32
    return %c0_i32, %arg0 : i32, i32
  }
}

</mosaic_0001>

<bundles_post_ra>
// kernel: ehr_classifier.1
= control target key start
LH: loop header
LB: loop body
LE: loop exit
PB: predicated region body
PF: predicated region fallthrough
CT: control target
= control target key end

     0   :  { %7 = vsyncpa [#allocation3], 0  ;;  %s368_s9 = smov [#allocation2]   ;;  %s474_s0 = inlined_call_operand.vmem [shape: f32[2,128], index: 0, kind: input, shape index: {}]   ;;  %s475_s1 = inlined_call_operand.hbm [shape: f32[16,128], index: 1, kind: input, shape index: {}]   ;;  %s476_s2 = inlined_call_operand.vmem [shape: f32[8,128], index: 2, kind: output, shape index: {}]  }
   0x1   :  { %s15_s10 = sshll.u32 %s368_s9, 4  ;;  %s344_s13 = scalar_lea.hbm %s475_s1, 256  ;;  %s16_s10 = int_to_ptr.vmem [resolvable:$true] %s15_s10 }
   0x2   :  { %p345_p0 = scmp.ne.s32.totalorder %s475_s1, %s344_s13  ;;  %p348_p1 = scmp.lt.u32.totalorder %s344_s13, %s475_s1 }
   0x4   :  { %p350_p2 = pnand %p348_p1, %p345_p0 }
   0x6   :  { %353 = shalt.err (!%p350_p2)
}
   0x7   :  { %s354_s18 = scalar_lea.vmem %s16_s10, 256  ;;  %p359_p4 = scmp.lt.s32.totalorder %s16_s10, %s16_s10 }
   0x8   :  { %p355_p3 = scmp.ne.s32.totalorder %s16_s10, %s354_s18  ;;  %p360_p5 = scmp.lt.s32.totalorder %s354_s18, %s354_s18 }
   0xa   :  { %p361_p6 = por %p360_p5, %p359_p4 }
   0xc   :  { %p362_p7 = pnand %p361_p6, %p355_p3 }
   0xe   :  { %365 = shalt.err (!%p362_p7)
}
   0xf   :  { %s369_s19 = smov 128   ;;  %s370_s20 = smov 8  }
  0x10   :  { %21 = dma.hbm_to_vmem [thread:$0]  %s475_s1, 256, %s16_s10, [#allocation3], %s369_s19, %s369_s19, %s370_s20  }
  0x11   :  { %366 = dma.done.wait [#allocation3], 256  }
  0x12   :  { %367 = vsyncadd [#allocation3], 4294967040  ;;  %v371_v0 = vmov 2   ;;  %v372_v1 = vmov 1   ;;  %v420_v2 = vld [vmem:[#allocation2] sm:$0xff]  ;;  %v373_v3 = vmov 8   ;;  %v31_v24 = vlaneseq }
  0x13   :  { %314 = vset.pattern.permute.xlu1 %v371_v0  ;;  %313 = vset.pattern.permute.xlu0 %v372_v1  ;;  %v374_v4 = vmov 9   ;;  %v375_v5 = vmov 3   ;;  %v376_v6 = vmov 0   ;;  %v28_v7 = vld [vmem:[#allocation2 + $0x8] sm:$0xff]  ;;  %v377_v8 = vmov 10  }
  0x14   :  { %47 = vperm.xlu1 %314, %v420_v2   ;;  %38 = vperm.xlu0 %313, %v420_v2   ;;  %v378_v9 = vmov 11   ;;  %v379_v10 = vmov 15   ;;  %v380_v11 = vmov 12   ;;  %v381_v12 = vmov 18   ;;  %v25_v25 = vld [vmem:[%s474_s0] sm:$0x1] }
  0x15   :  { %v382_v13 = vmov 21   ;;  %v383_v14 = vmov 13   ;;  %v384_v15 = vmov 4   ;;  %v385_v16 = vmov 14   ;;  %v286_v34 = vld [vmem:[%s474_s0 + $0x1] ss:$0 sm:$0xff] }
  0x16   :  { %v386_v17 = vmov 5   ;;  %v387_v18 = vmov 16   ;;  %v388_v19 = vmov 17   ;;  %v389_v20 = vmov 19  }
  0x17   :  { %v390_v21 = vmov 20   ;;  %v391_v22 = vmov 22   ;;  %v392_v23 = vmov 23   ;;  %v448_v26 = vshrl.u32 %v31_v24, 7 }
  0x18   :  { %315 = vset.pattern.permute.xlu1 %v373_v3  ;;  %317 = vset.pattern.permute.xlu0 %v374_v4  ;;  %vm29_vm0 = vcmp.lt.f32.partialorder %v25_v25, 0.5 }
  0x19   :  { %81 = vperm.xlu1 %315, %v420_v2   ;;  %91 = vperm.xlu0 %317, %v420_v2   ;;  %v33_v28 = vsub.s32 0, %v448_v26  ;;  %v30_v30 = vsel %vm29_vm0, 1, %v376_v6  ;;  %v96_v43 = vsub.s32 1, %v448_v26  ;;  %v106_v47 = vsub.s32 2, %v448_v26 }
  0x1a   :  { %v116_v55 = vsub.s32 3, %v448_v26  ;;  %v126_v57 = vsub.s32 4, %v448_v26  ;;  %v136_v61 = vsub.s32 5, %v448_v26  ;;  %vm272_vm2 = vcmp.ge.s32.totalorder %v448_v26, 4 }
  0x1b   :  { %v34_v31 = vrot.slane %v30_v30, %v33_v28 }
  0x1d   :  { %316 = vset.pattern.permute.xlu1 %v375_v5  ;;  %318 = vset.pattern.permute.xlu0 %v376_v6  ;;  %vm455_vm1 = vcmp.eq.s32.totalorder %v34_v31, 1 }
  0x1e   :  { %77 = vperm.xlu1 %316, %v420_v2   ;;  %57 = vperm.xlu0 %318, %v420_v2  }
  0x22   :  { %319 = vset.pattern.permute.xlu1 %v377_v8  ;;  %61 = vperm.xlu0 %318, %v28_v7  }
  0x23   :  { %101 = vperm.xlu1 %319, %v420_v2  }
  0x26   :  { %323 = vset.pattern.permute.xlu0 %v371_v0 }
  0x27   :  { %320 = vset.pattern.permute.xlu1 %v378_v9  ;;  %51 = vperm.xlu0 %323, %v28_v7  }
  0x28   :  { %111 = vperm.xlu1 %320, %v420_v2  }
  0x2b   :  { %326 = vset.pattern.permute.xlu0 %v379_v10  ;;  %v156_v10 = vsub.s32 7, %v448_v26 }
  0x2c   :  { %321 = vset.pattern.permute.xlu1 %v380_v11  ;;  %151 = vperm.xlu0 %326, %v420_v2  }
  0x2d   :  { %121 = vperm.xlu1 %321, %v420_v2  }
  0x30   :  { %329 = vset.pattern.permute.xlu0 %v381_v12 }
  0x31   :  { %322 = vset.pattern.permute.xlu1 %v372_v1  ;;  %181 = vperm.xlu0 %329, %v420_v2  }
  0x32   :  { %43 = vperm.xlu1 %322, %v28_v7   ;;  %v146_v7 = vsub.s32 6, %v448_v26 }
  0x35   :  { %332 = vset.pattern.permute.xlu0 %v382_v13 }
  0x36   :  { %324 = vset.pattern.permute.xlu1 %v383_v14  ;;  %211 = vperm.xlu0 %332, %v420_v2  }
  0x37   :  { %131 = vperm.xlu1 %324, %v420_v2  }
  0x3a   :  { %335 = vset.pattern.permute.xlu0 %v384_v15 }
  0x3b   :  { %325 = vset.pattern.permute.xlu1 %v385_v16  ;;  %261 = vperm.xlu0 %335, %v420_v2  }
  0x3c   :  { %141 = vperm.xlu1 %325, %v420_v2  }
  0x3f   :  { %337 = vset.pattern.permute.xlu0 %v386_v17 }
  0x40   :  { %327 = vset.pattern.permute.xlu1 %v387_v18 }
  0x41   :  { %161 = vperm.xlu1 %327, %v420_v2  }
  0x45   :  { %328 = vset.pattern.permute.xlu1 %v388_v19 }
  0x46   :  { %171 = vperm.xlu1 %328, %v420_v2  }
  0x4a   :  { %330 = vset.pattern.permute.xlu1 %v389_v20 }
  0x4b   :  { %191 = vperm.xlu1 %330, %v420_v2  }
  0x4f   :  { %331 = vset.pattern.permute.xlu1 %v390_v21 }
  0x50   :  { %201 = vperm.xlu1 %331, %v420_v2  }
  0x54   :  { %333 = vset.pattern.permute.xlu1 %v391_v22 }
  0x55   :  { %221 = vperm.xlu1 %333, %v420_v2  }
  0x59   :  { %334 = vset.pattern.permute.xlu1 %v392_v23 }
  0x5a   :  { %231 = vperm.xlu1 %334, %v420_v2  }
  0x5e   :  { %336 = vset.pattern.permute.xlu1 %v386_v17 }
  0x5f   :  { %266 = vperm.xlu1 %336, %v420_v2  }
  0x93   :  { %v48_v27 = vpop.permute.xlu1 %47  ;;  %v39_v29 = vpop.permute.xlu0 %38 }
  0x94   :  { %v54_v39 = vsel %vm455_vm1, %v39_v29, %v48_v27 }
  0x98   :  { %v82_v32 = vpop.permute.xlu1 %81  ;;  %v92_v33 = vpop.permute.xlu0 %91 }
  0x9d   :  { %v78_v36 = vpop.permute.xlu1 %77  ;;  %v58_v37 = vpop.permute.xlu0 %57 }
  0x9e   :  { %v68_v38 = vmul.f32 %v286_v34, %v58_v37 }
  0xa0   :  { %v70_v40 = vadd.f32 %v68_v38, %v54_v39 }
  0xa1   :  { %v62_v54 = vpop.permute.xlu0 %61 }
  0xa2   :  { %v72_v41 = vmax.f32 %v70_v40, 0.0  ;;  %v102_v42 = vpop.permute.xlu1 %101  ;;  %v69_v62 = vmul.f32 %v286_v34, %v62_v54 }
  0xa4   :  { %v87_v44 = vrot.slane %v72_v41, %v33_v28  ;;  %v97_v48 = vrot.slane %v72_v41, %v96_v43  ;;  %v107_v51 = vrot.slane %v72_v41, %v106_v47  ;;  %v117_v60 = vrot.slane %v72_v41, %v116_v55 }
  0xa5   :  { %v127_v1 = vrot.slane %v72_v41, %v126_v57  ;;  %v137_v6 = vrot.slane %v72_v41, %v136_v61  ;;  %v147_v12 = vrot.slane %v72_v41, %v146_v7  ;;  %v157_v18 = vrot.slane %v72_v41, %v156_v10 }
  0xa6   :  { %v88_v45 = vmul.f32 %v87_v44, %v82_v32  ;;  %v98_v50 = vmul.f32 %v97_v48, %v92_v33  ;;  %v108_v56 = vmul.f32 %v107_v51, %v102_v42  ;;  %v52_v0 = vpop.permute.xlu0 %51 }
  0xa7   :  { %v112_v46 = vpop.permute.xlu1 %111 }
  0xa8   :  { %v89_v49 = vadd.f32 %v88_v45, %v78_v36  ;;  %v118_v63 = vmul.f32 %v117_v60, %v112_v46 }
  0xaa   :  { %v99_v53 = vadd.f32 %v98_v50, %v89_v49 }
  0xab   :  { %v152_v17 = vpop.permute.xlu0 %151 }
  0xac   :  { %v122_v52 = vpop.permute.xlu1 %121  ;;  %v109_v59 = vadd.f32 %v108_v56, %v99_v53  ;;  %v158_v20 = vmul.f32 %v157_v18, %v152_v17 }
  0xad   :  { %v128_v4 = vmul.f32 %v127_v1, %v122_v52 }
  0xae   :  { %v119_v3 = vadd.f32 %v118_v63, %v109_v59 }
  0xb0   :  { %v129_v11 = vadd.f32 %v128_v4, %v119_v3  ;;  %v182_v33 = vpop.permute.xlu0 %181 }
  0xb1   :  { %v44_v58 = vpop.permute.xlu1 %43 }
  0xb2   :  { %v55_v2 = vsel %vm455_vm1, %v44_v58, %v52_v0 }
  0xb3   :  { %v71_v8 = vadd.f32 %v69_v62, %v55_v2 }
  0xb5   :  { %v73_v14 = vmax.f32 %v71_v8, 0.0 }
  0xb6   :  { %v132_v5 = vpop.permute.xlu1 %131 }
  0xb7   :  { %v138_v9 = vmul.f32 %v137_v6, %v132_v5  ;;  %v167_v22 = vrot.slane %v73_v14, %v33_v28  ;;  %v177_v25 = vrot.slane %v73_v14, %v96_v43  ;;  %v187_v29 = vrot.slane %v73_v14, %v106_v47  ;;  %v212_v28 = vpop.permute.xlu0 %211 }
  0xb8   :  { %v197_v36 = vrot.slane %v73_v14, %v116_v55  ;;  %v207_v39 = vrot.slane %v73_v14, %v126_v57  ;;  %v217_v41 = vrot.slane %v73_v14, %v136_v61  ;;  %v227_v48 = vrot.slane %v73_v14, %v146_v7 }
  0xb9   :  { %v139_v15 = vadd.f32 %v138_v9, %v129_v11  ;;  %v188_v34 = vmul.f32 %v187_v29, %v182_v33  ;;  %v237_v50 = vrot.slane %v73_v14, %v156_v10 }
  0xba   :  { %v218_v46 = vmul.f32 %v217_v41, %v212_v28 }
  0xbb   :  { %v142_v13 = vpop.permute.xlu1 %141  ;;  %v262_v9 = vpop.permute.xlu0 %261 }
  0xbc   :  { %v148_v16 = vmul.f32 %v147_v12, %v142_v13 }
  0xbe   :  { %v149_v19 = vadd.f32 %v148_v16, %v139_v15 }
  0xc0   :  { %v162_v21 = vpop.permute.xlu1 %161  ;;  %v159_v23 = vadd.f32 %v158_v20, %v149_v19 }
  0xc1   :  { %v168_v24 = vmul.f32 %v167_v22, %v162_v21 }
  0xc3   :  { %v169_v30 = vadd.f32 %v168_v24, %v159_v23 }
  0xc5   :  { %v172_v27 = vpop.permute.xlu1 %171 }
  0xc6   :  { %v178_v31 = vmul.f32 %v177_v25, %v172_v27 }
  0xc8   :  { %v179_v32 = vadd.f32 %v178_v31, %v169_v30 }
  0xca   :  { %v192_v35 = vpop.permute.xlu1 %191  ;;  %v189_v37 = vadd.f32 %v188_v34, %v179_v32 }
  0xcb   :  { %v198_v38 = vmul.f32 %v197_v36, %v192_v35 }
  0xcd   :  { %v199_v42 = vadd.f32 %v198_v38, %v189_v37 }
  0xcf   :  { %v202_v40 = vpop.permute.xlu1 %201 }
  0xd0   :  { %v208_v44 = vmul.f32 %v207_v39, %v202_v40 }
  0xd2   :  { %v209_v45 = vadd.f32 %v208_v44, %v199_v42 }
  0xd4   :  { %v222_v43 = vpop.permute.xlu1 %221  ;;  %v219_v47 = vadd.f32 %v218_v46, %v209_v45 }
  0xd5   :  { %v228_v49 = vmul.f32 %v227_v48, %v222_v43 }
  0xd7   :  { %v229_v52 = vadd.f32 %v228_v49, %v219_v47 }
  0xd9   :  { %v232_v51 = vpop.permute.xlu1 %231 }
  0xda   :  { %v238_v53 = vmul.f32 %v237_v50, %v232_v51 }
  0xdc   :  { %v239_v54 = vadd.f32 %v238_v53, %v229_v52 }
  0xde   :  { %v240_v55 = vrot.slane %v239_v54, 4  ;;  %v267_v11 = vpop.permute.xlu1 %266 }
  0xe0   :  { %v241_v56 = vadd.f32 %v240_v55, %v239_v54 }
  0xe2   :  { %v242_v58 = vrot.slane %v241_v56, 2 }
  0xe4   :  { %v243_v57 = vadd.f32 %v242_v58, %v241_v56 }
  0xe6   :  { %v244_v59 = vrot.slane %v243_v57, 1 }
  0xe8   :  { %v245_v60 = vadd.f32 %v244_v59, %v243_v57 }
  0xea   :  { %v247_v61 = vmul.f32 0.125, %v245_v60 }
  0xec   :  { %v248_v62 = vsub.f32 %v239_v54, %v247_v61 }
  0xee   :  { %v249_v63 = vmul.f32 %v248_v62, %v248_v62 }
  0xf0   :  { %v250_v0 = vrot.slane %v249_v63, 4 }
  0xf2   :  { %v251_v1 = vadd.f32 %v250_v0, %v249_v63 }
  0xf4   :  { %v252_v2 = vrot.slane %v251_v1, 2 }
  0xf6   :  { %v253_v3 = vadd.f32 %v252_v2, %v251_v1 }
  0xf8   :  { %v254_v4 = vrot.slane %v253_v3, 1 }
  0xfa   :  { %v255_v5 = vadd.f32 %v254_v4, %v253_v3 }
  0xfc   :  { %v256_v6 = vmul.f32 0.125, %v255_v5 }
  0xfe   :  { %v257_v7 = vadd.f32 1e-05, %v256_v6 }
 0x100   :  { %338 = vrsqrt.f32 %v257_v7 }
 0x10a   :  { %v339_v8 = vpop.eup %338 }
 0x10b   :  { %v259_v10 = vmul.f32 %v339_v8, %v248_v62 }
 0x10d   :  { %v264_v12 = vmul.f32 %v262_v9, %v259_v10 }
 0x10f   :  { %v269_v13 = vadd.f32 %v267_v11, %v264_v12 }
 0x111   :  { %v287_v14 = vmul.f32 -1.442695, %v269_v13 }
 0x113   :  { %340 = vpow2.f32 %v287_v14 }
 0x11d   :  { %v341_v15 = vpop.eup %340 }
 0x11e   :  { %v276_v16 = vadd.f32 1.0, %v341_v15 }
 0x120   :  { %342 = vrcp.f32 %v276_v16 }
 0x12a   :  { %v343_v17 = vpop.eup %342 }
 0x12b   :  { %v279_v18 = vsel %vm272_vm2, %v343_v17, %v269_v13 }
 0x12c   :  { %280 = vst [vmem:[%s476_s2] sm:$0xff] %v279_v18 }
 0x12d   :  { %285 = vsyncpa [#allocation3], 1 }

</bundles_post_ra>
